<compile_context>
chip_gen: v7x
topology: tpu7x:2x2x1
jax: 0.10.0
libtpu: 0.0.40
codegen_flags: <defaults>
</compile_context>

<pallas_src>
import functools

import jax
import jax.numpy as jnp
from jax.experimental import pallas as pl
from jax.experimental.pallas import tpu as pltpu


def _round_up(x, m):
    return (x + m - 1) // m * m


def _vmem_capacity_bytes():
    try:
        return int(pltpu.get_tpu_info().vmem_capacity_bytes)
    except Exception:
        return 64 * 1024 * 1024  # conservative fallback (v7x-sized)


def _choose_tiles(n, c, itemsize, total_budget, mult):
    """Pick (tm, tc) so the double-buffered VMEM working set fits the budget."""
    lane = 128
    c_pad = _round_up(c, lane)          # VMEM lane padding of the pred block
    narrow = 2048                       # tgt + out blocks, 2 bufs each, lane-padded

    # Rows that fit with the full class dim in one block (double buffered).
    full_c_row_bytes = 2 * c_pad * itemsize + narrow
    tm_full = (total_budget // full_c_row_bytes) // mult * mult

    if tm_full >= 64:
        # Small / medium C: single-pass softmax over the whole class dim.
        tm, tc = tm_full, c
    else:
        # Vocab-scale C: tile the class dim, online logsumexp accumulators.
        tm = 256
        row_scratch = 4 * lane * 4      # m, l, gathered, sum(pred), lane-padded
        tc = (total_budget // tm - narrow - row_scratch) // (2 * itemsize)
        tc = max(lane, tc // lane * lane)
        if tc >= c:
            tc = c

    # Do not exceed the (rounded-up) row count; keep >= 2 row blocks when N
    # allows so the "parallel" row axis can shard across v7x's two TensorCores.
    n_cap = _round_up(max(n, 1), mult)
    tm = min(tm, n_cap)
    if n_cap > mult:
        tm = min(tm, max(mult, _round_up((n + 1) // 2, mult)))
    tm = max(tm, mult)
    return tm, tc


def _ce_loss_kernel(pred_ref, tgt_ref, loss_ref, *scratch,
                    c_total, label_smooth_params, mask_tail):
    """Cross-entropy for one [tm, tc] logits block.

    pred_ref: [tm, tc] logits block (any float dtype; math is f32)
    tgt_ref:  [tm, 1] int32 target class per row
    loss_ref: [tm, 1] f32 per-row loss (written on the last class block)
    scratch:  () for single-pass, or (m, l, gathered[, sum_pred]) online
              logsumexp accumulators, each [tm, 1] f32.
    """
    kc = pl.program_id(1)
    pred = pred_ref[...].astype(jnp.float32)           # [tm, tc]
    tgt = tgt_ref[...]                                  # [tm, 1] int32
    tm, tc = pred.shape

    # Global class ids of this block's columns; one-hot built in-register.
    col_ids = kc * tc + jax.lax.broadcasted_iota(jnp.int32, (tm, tc), 1)
    onehot = col_ids == tgt

    if mask_tail:                                       # last class block may
        valid = col_ids < c_total                       # overrun C
        pred_v = jnp.where(valid, pred, -jnp.inf)
    else:
        pred_v = pred

    gathered = jnp.sum(jnp.where(onehot, pred, 0.0), axis=1, keepdims=True)
    if label_smooth_params is not None:
        pos, neg, t_sum = label_smooth_params
        if mask_tail:
            sp_blk = jnp.sum(jnp.where(valid, pred, 0.0), axis=1, keepdims=True)
        else:
            sp_blk = jnp.sum(pred, axis=1, keepdims=True)

    if not scratch:
        # Single pass over the full class dim (no accumulators needed).
        m = jnp.max(pred_v, axis=1, keepdims=True)
        lse = m + jnp.log(jnp.sum(jnp.exp(pred_v - m), axis=1, keepdims=True))
        if label_smooth_params is not None:
            loss_ref[...] = t_sum * lse - (neg * sp_blk + (pos - neg) * gathered)
        else:
            loss_ref[...] = lse - gathered
        return

    # Online logsumexp across class blocks (kc is the innermost grid axis).
    m_sc, l_sc, g_sc = scratch[:3]
    sp_sc = scratch[3] if label_smooth_params is not None else None

    @pl.when(kc == 0)
    def _():
        m_sc[...] = jnp.full_like(m_sc, -jnp.inf)
        l_sc[...] = jnp.zeros_like(l_sc)
        g_sc[...] = jnp.zeros_like(g_sc)
        if sp_sc is not None:
            sp_sc[...] = jnp.zeros_like(sp_sc)

    m_blk = jnp.max(pred_v, axis=1, keepdims=True)
    m_prev = m_sc[...]
    m_new = jnp.maximum(m_prev, m_blk)
    alpha = jnp.exp(m_prev - m_new)
    l_sc[...] = alpha * l_sc[...] + jnp.sum(jnp.exp(pred_v - m_new),
                                            axis=1, keepdims=True)
    m_sc[...] = m_new
    g_sc[...] = g_sc[...] + gathered
    if sp_sc is not None:
        sp_sc[...] = sp_sc[...] + sp_blk

    @pl.when(kc == pl.num_programs(1) - 1)
    def _():
        lse = m_sc[...] + jnp.log(l_sc[...])
        if label_smooth_params is not None:
            loss_ref[...] = t_sum * lse - (neg * sp_sc[...]
                                           + (pos - neg) * g_sc[...])
        else:
            loss_ref[...] = lse - g_sc[...]


def ce_loss(pred, target, *, label_smooth=None, class_num=None,
            block_rows=None, block_cols=None):
    """JAX/Pallas equivalent of CELoss.forward.

    block_rows / block_cols are optional tuning/testing overrides for the
    row / class tiles; by default they are derived from VMEM capacity.
    """
    pred = jnp.asarray(pred)                       # bf16/f32 accepted as-is
    target = jnp.asarray(target, dtype=jnp.int32)
    if pred.ndim != 2:
        raise ValueError('`pred` must be [N, M]')
    n, c = pred.shape
    if class_num is None:
        class_num = c
    if label_smooth is not None and class_num != c:
        raise ValueError('class_num must match pred.shape[1]')

    itemsize = jnp.dtype(pred.dtype).itemsize
    mult = 16 if itemsize < 4 else 8               # sublane granularity

    # Generation-aware VMEM budget: ~12 MiB on v5e/v6e (128 MiB physical,
    # 16/32 MiB scoped defaults), ~8 MiB on v7x (64 MiB physical).
    vmem_cap = _vmem_capacity_bytes()
    total_budget = max(2 << 20, min(12 << 20, vmem_cap // 8))

    tm, tc = _choose_tiles(n, c, itemsize, total_budget, mult)
    if block_rows is not None:
        tm = min(_round_up(int(block_rows), mult), _round_up(max(n, 1), mult))
    if block_cols is not None:
        tc = int(block_cols)
    if tc >= c or tc % 128 != 0:
        tc = c                                      # full class dim in one block

    nb = pl.cdiv(n, tm)
    cb = pl.cdiv(c, tc)
    mask_tail = (c % tc) != 0                       # only possible when cb > 1

    if label_smooth is not None:
        a = float(label_smooth) / (class_num - 1)
        b = 1.0 - float(label_smooth)
        # torch.clamp(one_hot.float(), min=a, max=b), resolved at trace time.
        pos = min(max(1.0, a), b)
        neg = min(max(0.0, a), b)
        t_sum = pos + (c - 1) * neg                 # folded sum of the smoothed
        ls_params = (pos, neg, t_sum)               # target distribution
    else:
        ls_params = None

    scratch = []
    if cb > 1:                                      # online-logsumexp accumulators
        num_acc = 4 if label_smooth is not None else 3
        scratch = [pltpu.VMEM((tm, 1), jnp.float32) for _ in range(num_acc)]

    kernel = functools.partial(
        _ce_loss_kernel, c_total=int(c),
        label_smooth_params=ls_params, mask_tail=mask_tail)

    per_row = pl.pallas_call(
        kernel,
        out_shape=jax.ShapeDtypeStruct((n, 1), jnp.float32),
        grid_spec=pltpu.PrefetchScalarGridSpec(
            num_scalar_prefetch=0,
            grid=(nb, cb),
            in_specs=[
                pl.BlockSpec((tm, tc), lambda i, k: (i, k)),
                pl.BlockSpec((tm, 1), lambda i, k: (i, 0)),
            ],
            out_specs=pl.BlockSpec((tm, 1), lambda i, k: (i, 0)),
            scratch_shapes=scratch,
        ),
        compiler_params=pltpu.CompilerParams(
            dimension_semantics=("parallel", "arbitrary"),
            vmem_limit_bytes=32 * 1024 * 1024),
    )(pred, target.reshape(n, 1))

    # Tiny final reduction (N scalars) in XLA.
    return jnp.mean(per_row)


class CELoss:
    """Label smooth cross entropy loss (Pallas TPU forward)."""

    def __init__(self, label_smooth=None, class_num=10):
        self.label_smooth = label_smooth
        self.class_num = class_num

    def __call__(self, pred, target):
        return ce_loss(pred, target, label_smooth=self.label_smooth,
                       class_num=self.class_num)


def _ce_loss_ref(pred, target, label_smooth=None, class_num=10):
    """Pure-JAX reference mirroring the PyTorch module exactly."""
    eps = 1e-12
    pred = pred.astype(jnp.float32)
    if label_smooth is not None:
        logprobs = jax.nn.log_softmax(pred, axis=1)
        t = jax.nn.one_hot(target, class_num, dtype=jnp.float32)
        t = jnp.clip(t, label_smooth / (class_num - 1), 1.0 - label_smooth)
        loss = -jnp.sum(t * logprobs, axis=1)                      # [N]
    else:
        g = jnp.take_along_axis(pred, target[:, None], axis=1)     # [N, 1]
        s = jnp.log(jnp.sum(jnp.exp(pred + eps), axis=1))          # [N]
        loss = -1.0 * g + s    # broadcasts to [N, N], same as the torch code
    return loss.mean()


if __name__ == "__main__":
    key = jax.random.PRNGKey(0)
    n, class_num = 8, 10
    k1, k2, k3 = jax.random.split(key, 3)
    pred = jax.random.normal(k1, (n, class_num), dtype=jnp.float32) * 2.0
    target = jax.random.randint(k2, (n,), 0, class_num)

    loss_smooth = CELoss(label_smooth=0.1, class_num=class_num)(pred, target)
    loss_plain = CELoss(label_smooth=None, class_num=class_num)(pred, target)

    # Exercise the C-tiled online-logsumexp path (plus tail-column masking,
    # a partial row block and bf16 inputs) by forcing small tiles.
    n2, c2 = 12, 320
    pred2 = jax.random.normal(k3, (n2, c2), dtype=jnp.bfloat16)
    target2 = jax.random.randint(k2, (n2,), 0, c2)
    loss_tiled = ce_loss(pred2, target2, label_smooth=0.05, class_num=c2,
                         block_rows=16, block_cols=128)
    loss_tiled_plain = ce_loss(pred2, target2, label_smooth=None, class_num=c2,
                               block_rows=16, block_cols=128)

    jax.block_until_ready((loss_smooth, loss_plain, loss_tiled,
                           loss_tiled_plain))

    ref_smooth = _ce_loss_ref(pred, target, 0.1, class_num)
    ref_plain = _ce_loss_ref(pred, target, None, class_num)
    ref_tiled = _ce_loss_ref(pred2, target2, 0.05, c2)
    ref_tiled_plain = _ce_loss_ref(pred2, target2, None, c2)

    assert jnp.allclose(loss_smooth, ref_smooth, rtol=1e-5, atol=1e-5), (
        loss_smooth, ref_smooth)
    assert jnp.allclose(loss_plain, ref_plain, rtol=1e-5, atol=1e-5), (
        loss_plain, ref_plain)
    assert jnp.allclose(loss_tiled, ref_tiled, rtol=1e-4, atol=1e-4), (
        loss_tiled, ref_tiled)
    assert jnp.allclose(loss_tiled_plain, ref_tiled_plain,
                        rtol=1e-4, atol=1e-4), (loss_tiled_plain,
                                                ref_tiled_plain)
    print("KERNEL_OK")
</pallas_src>

<mosaic_0001>
module attributes {stable_mosaic.version = 11 : i64} {
  func.func @_ce_loss_kernel(%arg0: i32, %arg1: i32, %arg2: memref<8x10xf32, #tpu.memory_space<vmem>>, %arg3: memref<8x1xi32, #tpu.memory_space<vmem>>, %arg4: memref<8x1xf32, #tpu.memory_space<vmem>>) attributes {dimension_semantics = [#tpu.dimension_semantics<parallel>, #tpu.dimension_semantics<arbitrary>], iteration_bounds = array<i64: 1, 1>, scalar_prefetch = 0 : i64, scratch_operands = 0 : i64, tpu.core_type = #tpu.core_type<tc>, window_params = [{transform_indices = @transform_0, window_bounds = array<i64: 8, 10>}, {transform_indices = @transform_1, window_bounds = array<i64: 8, 1>}, {transform_indices = @transform_2, window_bounds = array<i64: 8, 1>}]} {
    %c0 = arith.constant 0 : index
    %c0_0 = arith.constant 0 : index
    %0 = vector.load %arg2[%c0, %c0_0] : memref<8x10xf32, #tpu.memory_space<vmem>>, vector<8x10xf32>
    %c0_1 = arith.constant 0 : index
    %c0_2 = arith.constant 0 : index
    %1 = vector.load %arg3[%c0_1, %c0_2] : memref<8x1xi32, #tpu.memory_space<vmem>>, vector<8x1xi32>
    %c10_i32 = arith.constant 10 : i32
    %2 = arith.muli %arg1, %c10_i32 : i32
    %3 = tpu.iota {dimensions = array<i32: 1>} : vector<8x10xi32>
    %4 = vector.broadcast %2 : i32 to vector<8x10xi32>
    %5 = arith.addi %4, %3 : vector<8x10xi32>
    %6 = vector.broadcast %1 : vector<8x1xi32> to vector<8x10xi32>
    %7 = arith.cmpi eq, %5, %6 : vector<8x10xi32>
    %cst = arith.constant 0.000000e+00 : f32
    %8 = vector.broadcast %cst : f32 to vector<8x10xf32>
    %9 = arith.select %7, %0, %8 : vector<8x10xi1>, vector<8x10xf32>
    %cst_3 = arith.constant dense<0.000000e+00> : vector<8xf32>
    %10 = vector.multi_reduction <add>, %9, %cst_3 [1] : vector<8x10xf32> to vector<8xf32>
    %11 = vector.shape_cast %10 : vector<8xf32> to vector<8x1xf32>
    %cst_4 = arith.constant dense<0.000000e+00> : vector<8xf32>
    %12 = vector.multi_reduction <add>, %0, %cst_4 [1] : vector<8x10xf32> to vector<8xf32>
    %13 = vector.shape_cast %12 : vector<8xf32> to vector<8x1xf32>
    %cst_5 = arith.constant dense<0xFF800000> : vector<8xf32>
    %14 = vector.multi_reduction <maximumf>, %0, %cst_5 [1] : vector<8x10xf32> to vector<8xf32>
    %15 = vector.shape_cast %14 : vector<8xf32> to vector<8x1xf32>
    %16 = vector.broadcast %15 : vector<8x1xf32> to vector<8x10xf32>
    %17 = arith.subf %0, %16 : vector<8x10xf32>
    %18 = math.exp %17 : vector<8x10xf32>
    %cst_6 = arith.constant dense<0.000000e+00> : vector<8xf32>
    %19 = vector.multi_reduction <add>, %18, %cst_6 [1] : vector<8x10xf32> to vector<8xf32>
    %20 = vector.shape_cast %19 : vector<8xf32> to vector<8x1xf32>
    %21 = math.log %20 : vector<8x1xf32>
    %22 = arith.addf %15, %21 : vector<8x1xf32>
    %cst_7 = arith.constant 1.000000e+00 : f32
    %23 = vector.broadcast %cst_7 : f32 to vector<8x1xf32>
    %24 = arith.mulf %23, %22 : vector<8x1xf32>
    %cst_8 = arith.constant 0.0111111114 : f32
    %25 = vector.broadcast %cst_8 : f32 to vector<8x1xf32>
    %26 = arith.mulf %25, %13 : vector<8x1xf32>
    %cst_9 = arith.constant 0.888888895 : f32
    %27 = vector.broadcast %cst_9 : f32 to vector<8x1xf32>
    %28 = arith.mulf %27, %11 : vector<8x1xf32>
    %29 = arith.addf %26, %28 : vector<8x1xf32>
    %30 = arith.subf %24, %29 : vector<8x1xf32>
    %c0_10 = arith.constant 0 : index
    %c0_11 = arith.constant 0 : index
    %31 = vector.load %arg4[%c0_10, %c0_11] : memref<8x1xf32, #tpu.memory_space<vmem>>, vector<8x1xf32>
    tpu.vector_store %arg4[%c0_10, %c0_11], %30 {strides = array<i32>} : memref<8x1xf32, #tpu.memory_space<vmem>>, vector<8x1xf32>,
    return
  }
  func.func @transform_0(%arg0: i32, %arg1: i32) -> (i32, i32) {
    %c0_i32 = arith.constant 0 : i32
    return %arg0, %arg1 : i32, i32
  }
  func.func @transform_1(%arg0: i32, %arg1: i32) -> (i32, i32) {
    %c0_i32 = arith.constant 0 : i32
    %c0_i32_0 = arith.constant 0 : i32
    return %arg0, %c0_i32 : i32, i32
  }
  func.func @transform_2(%arg0: i32, %arg1: i32) -> (i32, i32) {
    %c0_i32 = arith.constant 0 : i32
    %c0_i32_0 = arith.constant 0 : i32
    return %arg0, %c0_i32 : i32, i32
  }
}

</mosaic_0001>

<bundles_post_ra>
// kernel: tpu_custom_call.1
= control target key start
LH: loop header
LB: loop body
LE: loop exit
PB: predicated region body
PF: predicated region fallthrough
CT: control target
= control target key end

     0   :  { %vm23_vm0 = vcmask 80896   ;;  %v58_v1 = vmov 0   ;;  %v14_v7 = vlaneseq  ;;  %vm46_vm2 = vcmask 7168   ;;  %s87_s0 = inlined_call_operand.vmem [shape: f32[8,10], index: 0, kind: input, shape index: {}]   ;;  %s88_s1 = inlined_call_operand.vmem [shape: s32[8,1], index: 1, kind: input, shape index: {}]   ;;  %s89_s2 = inlined_call_operand.vmem [shape: f32[8,1], index: 2, kind: output, shape index: {}]  }
   0x1   :  { %v11_v0 = vld [vmem:[%s87_s0] sm:$0xff]  ;;  %53 = vset.pattern.permute.xlu0 %v58_v1 }
   0x2   :  { %v30_v2 = vsel %vm23_vm0, %v11_v0, -inf  ;;  %v12_v3 = vld [vmem:[%s88_s1] sm:$0xff]  ;;  %v15_v8 = vand.u32 127, %v14_v7  ;;  %v27_v14 = vsel %vm23_vm0, %v11_v0, 0.0 }
   0x3   :  { %31 = vmax.xlane.f32.xlu0 %v30_v2 }
  0x19   :  { %19 = vperm.xlu0 %53, %v12_v3  }
  0x90   :  { %v32_v4 = vpop.xlane.xlu0 %31 }
  0x91   :  { %v33_v5 = vsub.f32 %v11_v0, %v32_v4 }
  0x93   :  { %v34_v6 = vmul.f32 1.442695, %v33_v5 }
  0x95   :  { %54 = vpow2.f32 %v34_v6 }
  0x98   :  { %v20_v9 = vpop.permute.xlu0 %19 }
  0x99   :  { %vm21_vm1 = vcmp.eq.s32.totalorder %v15_v8, %v20_v9 }
  0x9a   :  { %v22_v11 = vsel %vm21_vm1, %v11_v0, 0.0 }
  0x9b   :  { %v24_v13 = vsel %vm23_vm0, %v22_v11, 0.0 }
  0x9f   :  { %v55_v10 = vpop.eup %54 }
  0xa0   :  { %v36_v12 = vsel %vm23_vm0, %v55_v10, 0.0 }
  0xa1   :  { %37 = vadd.xlane.f32.xlu1 %v36_v12 }
  0xa5   :  { %25 = vadd.xlane.f32.xlu1 %v24_v13 }
  0xa9   :  { %28 = vadd.xlane.f32.xlu1 %v27_v14 }
 0x12e   :  { %v38_v15 = vpop.xlane.xlu1 %37 }
 0x12f   :  { %56 = vlog2.f32 %v38_v15 }
 0x132   :  { %v26_v16 = vpop.xlane.xlu1 %25 }
 0x133   :  { %v43_v18 = vmul.f32 0.8888889, %v26_v16 }
 0x136   :  { %v29_v17 = vpop.xlane.xlu1 %28 }
 0x137   :  { %v42_v19 = vmul.f32 0.011111111, %v29_v17 }
 0x139   :  { %v57_v20 = vpop.eup %56  ;;  %v44_v23 = vadd.f32 %v43_v18, %v42_v19 }
 0x13a   :  { %v40_v21 = vmul.f32 0.6931472, %v57_v20 }
 0x13c   :  { %v41_v22 = vadd.f32 %v40_v21, %v32_v4 }
 0x13e   :  { %v45_v24 = vsub.f32 %v41_v22, %v44_v23 }
 0x140   :  { %47 = vst.msk [vmem:[%s89_s2] sm:$0xff] %vm46_vm2, %v45_v24 }

</bundles_post_ra>
